<compile_context>
chip_gen: v7x
topology: tpu7x:2x2x1
jax: 0.10.0
libtpu: 0.0.40
codegen_flags: <defaults>
</compile_context>

<pallas_src>
import functools

import jax
import jax.numpy as jnp
from jax.experimental import pallas as pl
from jax.experimental.pallas import tpu as pltpu


def _round_up(a, b):
    return ((a + b - 1) // b) * b


def _ffn_kernel(x_ref, w1_ref, w2_ref, o_ref, acc_ref):
    # x_ref  : (tile_m, E)      bf16 row tile (resident across the H axis)
    # w1_ref : (E, tile_h)      bf16 slab of the first-layer weight
    # w2_ref : (tile_h, E)      bf16 slab of the projection weight
    # o_ref  : (tile_m, E)      output tile (written on the last H step)
    # acc_ref: (tile_m, E) f32  VMEM accumulator
    h_idx = pl.program_id(1)

    @pl.when(h_idx == 0)
    def _():
        acc_ref[...] = jnp.zeros_like(acc_ref)

    h = jnp.dot(x_ref[...], w1_ref[...], preferred_element_type=jnp.float32)
    h = jnp.maximum(h, 0.0)
    h = h * h  # F.relu(x).square()
    acc_ref[...] += jnp.dot(h.astype(w2_ref.dtype), w2_ref[...],
                            preferred_element_type=jnp.float32)

    @pl.when(h_idx == pl.num_programs(1) - 1)
    def _():
        o_ref[...] = acc_ref[...].astype(o_ref.dtype)


def feed_forward(x, w1, w2, *, tile_m=256, tile_h=512,
                 compute_dtype=jnp.bfloat16):
    """x: (B, T, E); w1: (E, 4E); w2: (4E, E) -> (B, T, E)."""
    B, T, E = x.shape
    M = B * T
    H = w1.shape[1]
    assert w1.shape == (E, H) and w2.shape == (H, E)
    out_dtype = x.dtype
    cb = jnp.dtype(compute_dtype).itemsize
    ob = jnp.dtype(out_dtype).itemsize

    # Clamp tiles to the (padded) problem size while keeping vreg alignment:
    # tile_m multiple of 8 (sublanes), tile_h multiple of 128 (lanes).
    tile_m = min(tile_m, _round_up(M, 8))
    tile_h = min(tile_h, _round_up(H, 128))

    # If the full H-wide weight slabs comfortably fit the VMEM budget, widen
    # tile_h to cover all of H: one reduction step, weights DMA'd once per
    # row tile, no accumulator ping-pong.
    full_h = _round_up(H, 128)
    full_bytes = (2 * tile_m * E * cb + 2 * 2 * E * full_h * cb
                  + 2 * tile_m * E * ob + tile_m * E * 4
                  + tile_m * full_h * 4)
    if full_bytes <= (40 << 20):
        tile_h = full_h

    M_pad = _round_up(M, tile_m)
    H_pad = _round_up(H, tile_h)

    # bf16 MXU inputs; accumulation stays f32 inside the kernel.
    x2d = x.reshape(M, E).astype(compute_dtype)
    w1c = w1.astype(compute_dtype)
    w2c = w2.astype(compute_dtype)

    # Zero padding is exact: padded x rows only affect their own (discarded)
    # output rows, and padded H columns give relu(0)^2 @ 0-row-of-W2 = 0.
    if M_pad != M:
        x2d = jnp.pad(x2d, ((0, M_pad - M), (0, 0)))
    if H_pad != H:
        w1c = jnp.pad(w1c, ((0, 0), (0, H_pad - H)))
        w2c = jnp.pad(w2c, ((0, H_pad - H), (0, 0)))

    grid = (M_pad // tile_m, H_pad // tile_h)

    # Explicit VMEM budget from the tile sizes (double-buffered streams +
    # resident accumulator + hidden intermediate), capped for v7x's 64 MiB.
    vmem_bytes = (2 * tile_m * E * cb        # x tile (double-buffered)
                  + 2 * E * tile_h * cb      # W1 slab
                  + 2 * tile_h * E * cb      # W2 slab
                  + 2 * tile_m * E * ob      # output tile
                  + tile_m * E * 4           # f32 accumulator scratch
                  + tile_m * tile_h * 4)     # f32 hidden intermediate
    vmem_limit = min(max(int(vmem_bytes * 1.5) + (8 << 20), 32 << 20), 64 << 20)

    cost = pl.CostEstimate(
        flops=2 * 2 * M_pad * E * H_pad,          # two matmuls
        transcendentals=0,
        bytes_accessed=(M_pad * E * cb            # x read
                        + 2 * E * H_pad * cb * grid[0]  # W1+W2 per row tile
                        + M_pad * E * ob))        # output write

    out2d = pl.pallas_call(
        _ffn_kernel,
        out_shape=jax.ShapeDtypeStruct((M_pad, E), out_dtype),
        grid_spec=pltpu.PrefetchScalarGridSpec(
            num_scalar_prefetch=0,
            grid=grid,
            in_specs=[
                pl.BlockSpec((tile_m, E), lambda i, h: (i, 0)),   # x rows
                pl.BlockSpec((E, tile_h), lambda i, h: (0, h)),   # W1 H-slab
                pl.BlockSpec((tile_h, E), lambda i, h: (h, 0)),   # W2 H-slab
            ],
            out_specs=pl.BlockSpec((tile_m, E), lambda i, h: (i, 0)),
            scratch_shapes=[pltpu.VMEM((tile_m, E), jnp.float32)],
        ),
        compiler_params=pltpu.CompilerParams(
            dimension_semantics=("parallel", "arbitrary"),
            vmem_limit_bytes=vmem_limit),
        cost_estimate=cost,
    )(x2d, w1c, w2c)

    if M_pad != M:
        out2d = out2d[:M]
    return out2d.reshape(B, T, E)


def reference_ffn(x, w1, w2, compute_dtype=jnp.bfloat16):
    """Pure-JAX reference with the same bf16-in / f32-accumulate numerics."""
    B, T, E = x.shape
    xb = x.reshape(-1, E).astype(compute_dtype)
    h = jnp.dot(xb, w1.astype(compute_dtype),
                preferred_element_type=jnp.float32)
    h = jnp.square(jnp.maximum(h, 0.0))
    out = jnp.dot(h.astype(compute_dtype), w2.astype(compute_dtype),
                  preferred_element_type=jnp.float32)
    return out.reshape(B, T, E).astype(x.dtype)


if __name__ == "__main__":
    key = jax.random.PRNGKey(0)
    # Small but lane-dense shapes: E multiple of 128; M = 18 is ragged so the
    # row-padding path is exercised.  H = 4E = 512.
    B, T, E = 2, 9, 128
    H = 4 * E

    kx, kw1, kw2 = jax.random.split(key, 3)
    x = jax.random.normal(kx, (B, T, E), dtype=jnp.float32)

    # nn.Linear(E, 4E, bias=False): weight ~ U(-1/sqrt(E), 1/sqrt(E)), stored
    # transposed (E, 4E) for the kernel.
    bound1 = 1.0 / float(E) ** 0.5
    w1 = jax.random.uniform(kw1, (E, H), jnp.float32, -bound1, bound1)
    # A nonzero W2 for a meaningful numerical check...
    bound2 = 1.0 / float(H) ** 0.5
    w2_nonzero = jax.random.uniform(kw2, (H, E), jnp.float32, -bound2, bound2)
    # ...and the module's actual init: feed_forward_projection.weight.zero_().
    w2_module = jnp.zeros((H, E), jnp.float32)

    # Multi-step H reduction path (tile_h=128 -> 4 reduction steps).
    run_stream = functools.partial(feed_forward, tile_m=256, tile_h=128)
    out_nz = jax.block_until_ready(run_stream(x, w1, w2_nonzero))
    ref_nz = reference_ffn(x, w1, w2_nonzero)
    assert out_nz.shape == (B, T, E)
    assert jnp.allclose(out_nz, ref_nz, atol=5e-3, rtol=5e-3), float(
        jnp.max(jnp.abs(out_nz - ref_nz)))

    # Single-step (weights fully resident) path + the module's zero-init W2.
    run_fused = functools.partial(feed_forward, tile_m=256, tile_h=512)
    out_nz2 = jax.block_until_ready(run_fused(x, w1, w2_nonzero))
    assert jnp.allclose(out_nz2, ref_nz, atol=5e-3, rtol=5e-3)

    out_zero = jax.block_until_ready(run_fused(x, w1, w2_module))
    assert jnp.allclose(out_zero, jnp.zeros_like(out_zero))

    print("KERNEL_OK")
</pallas_src>

<mosaic_0001>
module attributes {stable_mosaic.version = 11 : i64} {
  func.func @_ffn_kernel(%arg0: i32, %arg1: i32, %arg2: memref<24x128xbf16, #tpu.memory_space<vmem>>, %arg3: memref<128x512xbf16, #tpu.memory_space<vmem>>, %arg4: memref<512x128xbf16, #tpu.memory_space<vmem>>, %arg5: memref<24x128xf32, #tpu.memory_space<vmem>>, %arg6: memref<24x128xf32, #tpu.memory_space<vmem>>) attributes {dimension_semantics = [#tpu.dimension_semantics<parallel>, #tpu.dimension_semantics<arbitrary>], iteration_bounds = array<i64: 1, 1>, scalar_prefetch = 0 : i64, scratch_operands = 1 : i64, tpu.core_type = #tpu.core_type<tc>, window_params = [{transform_indices = @transform_0, window_bounds = array<i64: 24, 128>}, {transform_indices = @transform_1, window_bounds = array<i64: 128, 512>}, {transform_indices = @transform_2, window_bounds = array<i64: 512, 128>}, {transform_indices = @transform_3, window_bounds = array<i64: 24, 128>}]} {
    %c0_i32 = arith.constant 0 : i32
    %0 = arith.cmpi eq, %arg1, %c0_i32 : i32
    %1 = arith.extui %0 : i1 to i32
    %c0_i32_0 = arith.constant 0 : i32
    %2 = arith.cmpi ne, %1, %c0_i32_0 : i32
    scf.if %2 {
      %cst_14 = arith.constant 0.000000e+00 : f32
      %18 = vector.broadcast %cst_14 : f32 to vector<24x128xf32>
      %c0_15 = arith.constant 0 : index
      %c0_16 = arith.constant 0 : index
      %19 = vector.load %arg6[%c0_15, %c0_16] : memref<24x128xf32, #tpu.memory_space<vmem>>, vector<24x128xf32>
      tpu.vector_store %arg6[%c0_15, %c0_16], %18 {strides = array<i32>} : memref<24x128xf32, #tpu.memory_space<vmem>>, vector<24x128xf32>,
    } else {
    }
    %c0 = arith.constant 0 : index
    %c0_1 = arith.constant 0 : index
    %3 = vector.load %arg2[%c0, %c0_1] : memref<24x128xbf16, #tpu.memory_space<vmem>>, vector<24x128xbf16>
    %c0_2 = arith.constant 0 : index
    %c0_3 = arith.constant 0 : index
    %4 = vector.load %arg3[%c0_2, %c0_3] : memref<128x512xbf16, #tpu.memory_space<vmem>>, vector<128x512xbf16>
    %cst = arith.constant dense<0.000000e+00> : vector<24x512xf32>
    %5 = tpu.matmul %3, %4, %cst {dimension_numbers = #tpu.dot_dimension_numbers<[1], [0], [0], [1], [0, 0, 1, 1], [], []>} : vector<24x128xbf16>, vector<128x512xbf16>, vector<24x512xf32> -> vector<24x512xf32>
    %cst_4 = arith.constant 0.000000e+00 : f32
    %6 = vector.broadcast %cst_4 : f32 to vector<24x512xf32>
    %7 = arith.maximumf %5, %6 : vector<24x512xf32>
    %8 = arith.mulf %7, %7 : vector<24x512xf32>
    %c0_5 = arith.constant 0 : index
    %c0_6 = arith.constant 0 : index
    %9 = vector.load %arg6[%c0_5, %c0_6] : memref<24x128xf32, #tpu.memory_space<vmem>>, vector<24x128xf32>
    %10 = arith.truncf %8 : vector<24x512xf32> to vector<24x512xbf16>
    %c0_7 = arith.constant 0 : index
    %c0_8 = arith.constant 0 : index
    %11 = vector.load %arg4[%c0_7, %c0_8] : memref<512x128xbf16, #tpu.memory_space<vmem>>, vector<512x128xbf16>
    %cst_9 = arith.constant dense<0.000000e+00> : vector<24x128xf32>
    %12 = tpu.matmul %10, %11, %cst_9 {dimension_numbers = #tpu.dot_dimension_numbers<[1], [0], [0], [1], [0, 0, 1, 1], [], []>} : vector<24x512xbf16>, vector<512x128xbf16>, vector<24x128xf32> -> vector<24x128xf32>
    %13 = arith.addf %9, %12 : vector<24x128xf32>
    %c0_10 = arith.constant 0 : index
    %c0_11 = arith.constant 0 : index
    %14 = vector.load %arg6[%c0_10, %c0_11] : memref<24x128xf32, #tpu.memory_space<vmem>>, vector<24x128xf32>
    tpu.vector_store %arg6[%c0_10, %c0_11], %13 {strides = array<i32>} : memref<24x128xf32, #tpu.memory_space<vmem>>, vector<24x128xf32>,
    %c0_i32_12 = arith.constant 0 : i32
    %15 = arith.cmpi eq, %arg1, %c0_i32_12 : i32
    %16 = arith.extui %15 : i1 to i32
    %c0_i32_13 = arith.constant 0 : i32
    %17 = arith.cmpi ne, %16, %c0_i32_13 : i32
    scf.if %17 {
      %c0_14 = arith.constant 0 : index
      %c0_15 = arith.constant 0 : index
      %18 = vector.load %arg6[%c0_14, %c0_15] : memref<24x128xf32, #tpu.memory_space<vmem>>, vector<24x128xf32>
      %c0_16 = arith.constant 0 : index
      %c0_17 = arith.constant 0 : index
      %19 = vector.load %arg5[%c0_16, %c0_17] : memref<24x128xf32, #tpu.memory_space<vmem>>, vector<24x128xf32>
      tpu.vector_store %arg5[%c0_16, %c0_17], %18 {strides = array<i32>} : memref<24x128xf32, #tpu.memory_space<vmem>>, vector<24x128xf32>,
    } else {
    }
    return
  }
  func.func @transform_0(%arg0: i32, %arg1: i32) -> (i32, i32) {
    %c0_i32 = arith.constant 0 : i32
    %c0_i32_0 = arith.constant 0 : i32
    return %arg0, %c0_i32 : i32, i32
  }
  func.func @transform_1(%arg0: i32, %arg1: i32) -> (i32, i32) {
    %c0_i32 = arith.constant 0 : i32
    %c0_i32_0 = arith.constant 0 : i32
    return %c0_i32, %arg1 : i32, i32
  }
  func.func @transform_2(%arg0: i32, %arg1: i32) -> (i32, i32) {
    %c0_i32 = arith.constant 0 : i32
    %c0_i32_0 = arith.constant 0 : i32
    return %arg1, %c0_i32 : i32, i32
  }
  func.func @transform_3(%arg0: i32, %arg1: i32) -> (i32, i32) {
    %c0_i32 = arith.constant 0 : i32
    %c0_i32_0 = arith.constant 0 : i32
    return %arg0, %c0_i32 : i32, i32
  }
}

</mosaic_0001>

<bundles_post_ra>
// kernel: tpu_custom_call.1
= control target key start
LH: loop header
LB: loop body
LE: loop exit
PB: predicated region body
PF: predicated region fallthrough
CT: control target
= control target key end

     0   :  { %8 = vsyncpa [#allocation4], 0  ;;  %s1183_s0 = inlined_call_operand.hbm [shape: bf16[24,128], index: 0, kind: input, shape index: {}]   ;;  %s1184_s1 = inlined_call_operand.hbm [shape: bf16[128,512], index: 1, kind: input, shape index: {}]   ;;  %s1185_s2 = inlined_call_operand.hbm [shape: bf16[512,128], index: 2, kind: input, shape index: {}]   ;;  %s1186_s3 = inlined_call_operand.hbm [shape: f32[24,128], index: 3, kind: output, shape index: {}]  }
   0x1   :  { %9 = vsyncpa [#allocation7], 0 }
   0x2   :  { %10 = vsyncpa [#allocation5], 0  ;;  %s1100_s12 = smov [#allocation6]   ;;  %s1006_s16 = scalar_lea.hbm %s1184_s1, 4096 }
   0x3   :  { %s28_s13 = sshll.u32 %s1100_s12, 4  ;;  %p1007_p0 = scmp.ne.s32.totalorder %s1184_s1, %s1006_s16  ;;  %s29_s13 = int_to_ptr.vmem [resolvable:$true] %s28_s13 }
   0x4   :  { %p1010_p1 = scmp.lt.u32.totalorder %s1006_s16, %s1184_s1 }
   0x6   :  { %p1012_p2 = pnand %p1010_p1, %p1007_p0 }
   0x8   :  { %1015 = shalt.err (!%p1012_p2)
}
   0x9   :  { %s1016_s21 = scalar_lea.vmem %s29_s13, 4096  ;;  %p1021_p4 = scmp.lt.s32.totalorder %s29_s13, %s29_s13 }
   0xa   :  { %p1017_p3 = scmp.ne.s32.totalorder %s29_s13, %s1016_s21  ;;  %p1022_p5 = scmp.lt.s32.totalorder %s1016_s21, %s1016_s21 }
   0xc   :  { %p1023_p6 = por %p1022_p5, %p1021_p4 }
   0xe   :  { %p1024_p7 = pnand %p1023_p6, %p1017_p3 }
  0x10   :  { %1027 = shalt.err (!%p1024_p7)
}
  0x11   :  { %s1101_s22 = smov 256   ;;  %s1102_s23 = smov 16  }
  0x12   :  { %34 = dma.hbm_to_vmem [thread:$0]  %s1184_s1, 4096, %s29_s13, [#allocation7], %s1101_s22, %s1101_s22, %s1102_s23  }
  0x13   :  { %s1103_s26 = smov [#allocation3]   ;;  %s1028_s30 = scalar_lea.hbm %s1183_s0, 192 }
  0x14   :  { %s16_s27 = sshll.u32 %s1103_s26, 4  ;;  %p1029_p8 = scmp.ne.s32.totalorder %s1183_s0, %s1028_s30  ;;  %s17_s27 = int_to_ptr.vmem [resolvable:$true] %s16_s27 }
  0x15   :  { %p1032_p9 = scmp.lt.u32.totalorder %s1028_s30, %s1183_s0 }
  0x17   :  { %p1034_p10 = pnand %p1032_p9, %p1029_p8 }
  0x19   :  { %1037 = shalt.err (!%p1034_p10)
}
  0x1a   :  { %s1038_s8 = scalar_lea.vmem %s17_s27, 192  ;;  %p1043_p12 = scmp.lt.s32.totalorder %s17_s27, %s17_s27 }
  0x1b   :  { %p1039_p11 = scmp.ne.s32.totalorder %s17_s27, %s1038_s8  ;;  %p1044_p13 = scmp.lt.s32.totalorder %s1038_s8, %s1038_s8 }
  0x1d   :  { %p1045_p0 = por %p1044_p13, %p1043_p12 }
  0x1f   :  { %p1046_p1 = pnand %p1045_p0, %p1039_p11 }
  0x21   :  { %1049 = shalt.err (!%p1046_p1)
}
  0x22   :  { %s1104_s1 = smov 64   ;;  %s1105_s9 = smov 4  }
  0x23   :  { %22 = dma.hbm_to_vmem [thread:$0]  %s1183_s0, 192, %s17_s27, [#allocation4], %s1104_s1, %s1104_s1, %s1105_s9  }
  0x24   :  { %s1106_s12 = smov [#allocation8]   ;;  %s1050_s16 = scalar_lea.hbm %s1185_s2, 4096 }
  0x25   :  { %s40_s13 = sshll.u32 %s1106_s12, 4  ;;  %p1051_p2 = scmp.ne.s32.totalorder %s1185_s2, %s1050_s16  ;;  %s41_s13 = int_to_ptr.vmem [resolvable:$true] %s40_s13 }
  0x26   :  { %p1054_p3 = scmp.lt.u32.totalorder %s1050_s16, %s1185_s2 }
  0x28   :  { %p1056_p4 = pnand %p1054_p3, %p1051_p2 }
  0x2a   :  { %1059 = shalt.err (!%p1056_p4)
}
  0x2b   :  { %s1060_s21 = scalar_lea.vmem %s41_s13, 4096  ;;  %p1065_p6 = scmp.lt.s32.totalorder %s41_s13, %s41_s13 }
  0x2c   :  { %p1061_p5 = scmp.ne.s32.totalorder %s41_s13, %s1060_s21  ;;  %p1066_p7 = scmp.lt.s32.totalorder %s1060_s21, %s1060_s21 }
  0x2e   :  { %p1067_p8 = por %p1066_p7, %p1065_p6 }
  0x30   :  { %p1068_p9 = pnand %p1067_p8, %p1061_p5 }
  0x32   :  { %1071 = shalt.err (!%p1068_p9)
}
  0x33   :  { %46 = dma.hbm_to_vmem [thread:$0]  %s1185_s2, 4096, %s41_s13, [#allocation7], %s1104_s1, %s1104_s1, %s1105_s9  }
  0x34   :  { %1094 = dma.done.wait [#allocation4], 192  }
  0x35   :  { %1095 = vsyncadd [#allocation4], 4294967104 }
  0x36   :  { %1096 = dma.done.wait [#allocation7], 8192  }
  0x37   :  { %1097 = vsyncadd [#allocation7], 4294959104  ;;  %v1107_v0 = vmov 0   ;;  %v924_v1 = vld [vmem:[#allocation6 + $0x4] ss:$16 sps:$4 sm:$0xff]   ;;  %v978_v38 = vld [vmem:[#allocation8 + $0x48] sm:$0xff]  }
  0x38   :  { %301 = vmatprep.mubr.bf16.mxu0 %v1107_v0  ;;  %352 = vmatprep.mubr.bf16.mxu1 %v1107_v0  ;;  %v926_v2 = vld [vmem:[#allocation6 + $0xc] ss:$16 sps:$4 sm:$0xff]   ;;  %v928_v3 = vld [vmem:[#allocation6] ss:$16 sps:$4 sm:$0xff]   ;;  %v929_v4 = vld [vmem:[#allocation6 + $0x8] ss:$16 sps:$4 sm:$0xff]  }
  0x39   :  { %269 = vmatprep.subr.bf16.mxu0 %v924_v1  ;;  %320 = vmatprep.subr.bf16.mxu1 %v926_v2  ;;  %v930_v5 = vld [vmem:[#allocation6 + $0x24] ss:$16 sps:$4 sm:$0xff]   ;;  %v932_v6 = vld [vmem:[#allocation6 + $0x2c] ss:$16 sps:$4 sm:$0xff]   ;;  %v934_v7 = vld [vmem:[#allocation6 + $0x20] ss:$16 sps:$4 sm:$0xff]  }
  0x3a   :  { %270 = vmatpush1.bf16.msra.mxu0 %v928_v3  ;;  %321 = vmatpush1.bf16.msra.mxu1 %v929_v4  ;;  %v935_v8 = vld [vmem:[#allocation6 + $0x28] ss:$16 sps:$4 sm:$0xff]   ;;  %v936_v9 = vld [vmem:[#allocation6 + $0x44] ss:$16 sps:$4 sm:$0xff]   ;;  %v938_v10 = vld [vmem:[#allocation6 + $0x4c] ss:$16 sps:$4 sm:$0xff]  }
  0x3b   :  { %271 = vmatprep.subr.bf16.mxu0 %v930_v5  ;;  %322 = vmatprep.subr.bf16.mxu1 %v932_v6  ;;  %v940_v11 = vld [vmem:[#allocation6 + $0x40] ss:$16 sps:$4 sm:$0xff]   ;;  %v941_v12 = vld [vmem:[#allocation6 + $0x48] ss:$16 sps:$4 sm:$0xff]   ;;  %v942_v13 = vld [vmem:[#allocation6 + $0x64] ss:$16 sps:$4 sm:$0xff]  }
  0x3c   :  { %v944_v14 = vld [vmem:[#allocation6 + $0x6c] ss:$16 sps:$4 sm:$0xff]   ;;  %v946_v15 = vld [vmem:[#allocation6 + $0x60] ss:$16 sps:$4 sm:$0xff]   ;;  %v947_v16 = vld [vmem:[#allocation6 + $0x68] ss:$16 sps:$4 sm:$0xff]  }
  0x3d   :  { %v948_v17 = vld [vmem:[#allocation6 + $0x84] ss:$16 sps:$4 sm:$0xff]   ;;  %v950_v18 = vld [vmem:[#allocation6 + $0x8c] ss:$16 sps:$4 sm:$0xff]   ;;  %v952_v19 = vld [vmem:[#allocation6 + $0x80] ss:$16 sps:$4 sm:$0xff]  }
  0x3e   :  { %272 = vmatpush1.bf16.msra.mxu0 %v934_v7  ;;  %323 = vmatpush1.bf16.msra.mxu1 %v935_v8  ;;  %v953_v20 = vld [vmem:[#allocation6 + $0x88] ss:$16 sps:$4 sm:$0xff]   ;;  %v954_v21 = vld [vmem:[#allocation6 + $0xa4] ss:$16 sps:$4 sm:$0xff]   ;;  %v956_v22 = vld [vmem:[#allocation6 + $0xac] ss:$16 sps:$4 sm:$0xff]  }
  0x3f   :  { %273 = vmatprep.subr.bf16.mxu0 %v936_v9  ;;  %324 = vmatprep.subr.bf16.mxu1 %v938_v10  ;;  %v958_v23 = vld [vmem:[#allocation6 + $0xa0] ss:$16 sps:$4 sm:$0xff]   ;;  %v959_v24 = vld [vmem:[#allocation6 + $0xa8] ss:$16 sps:$4 sm:$0xff]   ;;  %v960_v25 = vld [vmem:[#allocation6 + $0xc4] ss:$16 sps:$4 sm:$0xff]  }
  0x40   :  { %v962_v26 = vld [vmem:[#allocation6 + $0xcc] ss:$16 sps:$4 sm:$0xff]   ;;  %v964_v27 = vld [vmem:[#allocation6 + $0xc0] ss:$16 sps:$4 sm:$0xff]   ;;  %v965_v28 = vld [vmem:[#allocation6 + $0xc8] ss:$16 sps:$4 sm:$0xff]  }
  0x41   :  { %v966_v29 = vld [vmem:[#allocation6 + $0xe4] ss:$16 sps:$4 sm:$0xff]   ;;  %v968_v30 = vld [vmem:[#allocation6 + $0xec] ss:$16 sps:$4 sm:$0xff]   ;;  %v970_v31 = vld [vmem:[#allocation6 + $0xe0] ss:$16 sps:$4 sm:$0xff]  }
  0x42   :  { %274 = vmatpush1.bf16.msra.mxu0 %v940_v11  ;;  %325 = vmatpush1.bf16.msra.mxu1 %v941_v12  ;;  %v971_v32 = vld [vmem:[#allocation6 + $0xe8] ss:$16 sps:$4 sm:$0xff]   ;;  %v974_v33 = vld [vmem:[#allocation8 + $0x40] sm:$0xff]   ;;  %v973_v42 = vld [vmem:[#allocation3 + $0x8] ss:$0 sps:$4 sm:$0xff]   ;;  %s1108_s2 = smov [#allocation9]  }
  0x43   :  { %275 = vmatprep.subr.bf16.mxu0 %v942_v13  ;;  %326 = vmatprep.subr.bf16.mxu1 %v944_v14  ;;  %v975_v34 = vld [vmem:[#allocation8 + $0xc0] sm:$0xff]   ;;  %v972_v35 = vld [vmem:[#allocation3] sm:$0xff]   ;;  %v979_v39 = vld [vmem:[#allocation8 + $0xc8] sm:$0xff]   ;;  %s778_s23 = sshll.u32 %s1108_s2, 4  ;;  %s779_s23 = int_to_ptr.vmem [resolvable:$true] %s778_s23 }
  0x44   :  { %v976_v36 = vld [vmem:[#allocation8] sm:$0xff]   ;;  %v980_v40 = vld [vmem:[#allocation8 + $0x8] sm:$0xff]   ;;  %v982_v43 = vld [vmem:[#allocation8 + $0x50] sm:$0xff]   ;;  %s1072_s24 = scalar_lea.vmem %s779_s23, 384  ;;  %p1077_p11 = scmp.lt.s32.totalorder %s779_s23, %s779_s23 }
  0x45   :  { %v977_v37 = vld [vmem:[#allocation8 + $0x80] sm:$0xff]   ;;  %v981_v41 = vld [vmem:[#allocation8 + $0x88] sm:$0xff]   ;;  %v983_v44 = vld [vmem:[#allocation8 + $0xd0] sm:$0xff]   ;;  %p1073_p10 = scmp.ne.s32.totalorder %s779_s23, %s1072_s24  ;;  %p1078_p12 = scmp.lt.s32.totalorder %s1072_s24, %s1072_s24 }
  0x46   :  { %276 = vmatpush1.bf16.msra.mxu0 %v946_v15  ;;  %327 = vmatpush1.bf16.msra.mxu1 %v947_v16  ;;  %v984_v45 = vld [vmem:[#allocation8 + $0x10] sm:$0xff]   ;;  %v986_v47 = vld [vmem:[#allocation8 + $0x58] sm:$0xff]   ;;  %v990_v51 = vld [vmem:[#allocation8 + $0x60] sm:$0xff]  }
  0x47   :  { %277 = vmatprep.subr.bf16.mxu0 %v948_v17  ;;  %328 = vmatprep.subr.bf16.mxu1 %v950_v18  ;;  %v985_v46 = vld [vmem:[#allocation8 + $0x90] sm:$0xff]   ;;  %v987_v48 = vld [vmem:[#allocation8 + $0xd8] sm:$0xff]   ;;  %v991_v52 = vld [vmem:[#allocation8 + $0xe0] sm:$0xff]   ;;  %p1079_p13 = por %p1078_p12, %p1077_p11 }
  0x48   :  { %v988_v49 = vld [vmem:[#allocation8 + $0x18] sm:$0xff]   ;;  %v992_v53 = vld [vmem:[#allocation8 + $0x20] sm:$0xff]   ;;  %v994_v55 = vld [vmem:[#allocation8 + $0x68] sm:$0xff]  }
  0x49   :  { %v989_v50 = vld [vmem:[#allocation8 + $0x98] sm:$0xff]   ;;  %v993_v54 = vld [vmem:[#allocation8 + $0xa0] sm:$0xff]   ;;  %v995_v56 = vld [vmem:[#allocation8 + $0xe8] sm:$0xff]   ;;  %p1080_p0 = pnand %p1079_p13, %p1073_p10 }
  0x4a   :  { %278 = vmatpush1.bf16.msra.mxu0 %v952_v19  ;;  %329 = vmatpush1.bf16.msra.mxu1 %v953_v20  ;;  %v996_v57 = vld [vmem:[#allocation8 + $0x28] sm:$0xff]   ;;  %v998_v59 = vld [vmem:[#allocation8 + $0x70] sm:$0xff]   ;;  %v1002_v63 = vld [vmem:[#allocation8 + $0x78] sm:$0xff]  }
  0x4b   :  { %279 = vmatprep.subr.bf16.mxu0 %v954_v21  ;;  %330 = vmatprep.subr.bf16.mxu1 %v956_v22  ;;  %v997_v58 = vld [vmem:[#allocation8 + $0xa8] sm:$0xff]   ;;  %v999_v60 = vld [vmem:[#allocation8 + $0xf0] sm:$0xff]   ;;  %v1004_v1 = vld [vmem:[#allocation8 + $0x38] sm:$0xff]  }
  0x4c   :  { %v1000_v61 = vld [vmem:[#allocation8 + $0x30] sm:$0xff]   ;;  %v1005_v2 = vld [vmem:[#allocation8 + $0xb8] sm:$0xff]  }
  0x4d   :  { %v1001_v62 = vld [vmem:[#allocation8 + $0xb0] sm:$0xff]  }
  0x4e   :  { %280 = vmatpush1.bf16.msra.mxu0 %v958_v23  ;;  %331 = vmatpush1.bf16.msra.mxu1 %v959_v24 }
  0x4f   :  { %281 = vmatprep.subr.bf16.mxu0 %v960_v25  ;;  %332 = vmatprep.subr.bf16.mxu1 %v962_v26 }
  0x52   :  { %282 = vmatpush1.bf16.msra.mxu0 %v964_v27  ;;  %333 = vmatpush1.bf16.msra.mxu1 %v965_v28 }
  0x53   :  { %283 = vmatprep.subr.bf16.mxu0 %v966_v29  ;;  %334 = vmatprep.subr.bf16.mxu1 %v968_v30 }
  0x56   :  { %284 = vmatpush1.bf16.msra.mxu0 %v970_v31  ;;  %335 = vmatpush1.bf16.msra.mxu1 %v971_v32 }
  0x57   :  { %857 = vmatprep.subr.bf16.mxu0 %v974_v33  ;;  %885 = vmatprep.subr.bf16.mxu1 %v975_v34 }
  0x59   :  { %302 = vmatmul.mubr.bf16.vlgmr.msra.gmra.mrb[0].mxu0 %v972_v35  ;;  %353 = vmatmul.mubr.bf16.vlgmr.msra.gmra.mrb[0].mxu1 %v972_v35 }
  0x5a   :  { %311 = vmatprep.mubr.bf16.mxu0 %v1107_v0  ;;  %362 = vmatprep.mubr.bf16.mxu1 %v1107_v0  ;;  %v1003_v0 = vld [vmem:[#allocation8 + $0xf8] sm:$0xff]  }
  0x5b   :  { %858 = vmatpush3.bf16.msra.mxu0 %v976_v36  ;;  %886 = vmatpush3.bf16.msra.mxu1 %v977_v37 }
  0x5c   :  { %859 = vmatprep.subr.bf16.mxu0 %v978_v38  ;;  %887 = vmatprep.subr.bf16.mxu1 %v979_v39 }
  0x5f   :  { %860 = vmatpush3.bf16.msra.mxu0 %v980_v40  ;;  %888 = vmatpush3.bf16.msra.mxu1 %v981_v41 }
  0x60   :  { %861 = vmatprep.subr.bf16.mxu0 %v982_v43  ;;  %889 = vmatprep.subr.bf16.mxu1 %v983_v44 }
  0x61   :  { %312 = vmatmul.mubr.bf16.gmra.mrb[4].mxu0 %v973_v42  ;;  %363 = vmatmul.mubr.bf16.gmra.mrb[4].mxu1 %v973_v42 }
  0x63   :  { %862 = vmatpush3.bf16.msra.mxu0 %v984_v45  ;;  %890 = vmatpush3.bf16.msra.mxu1 %v985_v46 }
  0x64   :  { %863 = vmatprep.subr.bf16.mxu0 %v986_v47  ;;  %891 = vmatprep.subr.bf16.mxu1 %v987_v48 }
  0x67   :  { %864 = vmatpush3.bf16.msra.mxu0 %v988_v49  ;;  %892 = vmatpush3.bf16.msra.mxu1 %v989_v50 }
  0x68   :  { %865 = vmatprep.subr.bf16.mxu0 %v990_v51  ;;  %893 = vmatprep.subr.bf16.mxu1 %v991_v52 }
  0x6b   :  { %866 = vmatpush3.bf16.msra.mxu0 %v992_v53  ;;  %894 = vmatpush3.bf16.msra.mxu1 %v993_v54 }
  0x6c   :  { %867 = vmatprep.subr.bf16.mxu0 %v994_v55  ;;  %895 = vmatprep.subr.bf16.mxu1 %v995_v56 }
  0x6f   :  { %868 = vmatpush3.bf16.msra.mxu0 %v996_v57  ;;  %896 = vmatpush3.bf16.msra.mxu1 %v997_v58 }
  0x70   :  { %869 = vmatprep.subr.bf16.mxu0 %v998_v59  ;;  %897 = vmatprep.subr.bf16.mxu1 %v999_v60 }
  0x73   :  { %870 = vmatpush3.bf16.msra.mxu0 %v1000_v61  ;;  %898 = vmatpush3.bf16.msra.mxu1 %v1001_v62 }
  0x74   :  { %871 = vmatprep.subr.bf16.mxu0 %v1002_v63  ;;  %899 = vmatprep.subr.bf16.mxu1 %v1003_v0 }
  0x77   :  { %872 = vmatpush3.bf16.msra.mxu0 %v1004_v1  ;;  %900 = vmatpush3.bf16.msra.mxu1 %v1005_v2 }
 0x12c   :  { %v303_v3 = vpop.f32.mrb[0].mxu0  ;;  %v354_v4 = vpop.f32.mrb[0].mxu1 }
 0x12d   :  { %v371_v5 = vmax.f32 %v303_v3, 0.0  ;;  %v373_v6 = vmax.f32 %v354_v4, 0.0  ;;  %v305_v7 = vpop.f32.mrb[1].mxu0  ;;  %v356_v8 = vpop.f32.mrb[1].mxu1 }
 0x12e   :  { %v372_v9 = vmax.f32 %v305_v7, 0.0  ;;  %v374_v10 = vmax.f32 %v356_v8, 0.0  ;;  %v307_v11 = vpop.f32.mrb[2].mxu0  ;;  %v358_v12 = vpop.f32.mrb[2].mxu1 }
 0x12f   :  { %v375_v13 = vmax.f32 %v307_v11, 0.0  ;;  %v377_v14 = vmax.f32 %v358_v12, 0.0  ;;  %v309_v15 = vpop.f32.mrb[3].mxu0  ;;  %v360_v16 = vpop.f32.mrb[3].mxu1  ;;  %v383_v19 = vmul.f32 %v371_v5, %v371_v5  ;;  %v385_v20 = vmul.f32 %v373_v6, %v373_v6 }
 0x130   :  { %v376_v17 = vmax.f32 %v309_v15, 0.0  ;;  %v378_v18 = vmax.f32 %v360_v16, 0.0  ;;  %v384_v23 = vmul.f32 %v372_v9, %v372_v9  ;;  %v386_v24 = vmul.f32 %v374_v10, %v374_v10 }
 0x131   :  { %v387_v21 = vmul.f32 %v375_v13, %v375_v13  ;;  %v389_v22 = vmul.f32 %v377_v14, %v377_v14 }
 0x132   :  { %v388_v25 = vmul.f32 %v376_v17, %v376_v17  ;;  %v390_v26 = vmul.f32 %v378_v18, %v378_v18 }
 0x133   :  { %v398_v27 = vpack.c.bf16 %v387_v21, %v383_v19  ;;  %v400_v28 = vpack.c.bf16 %v389_v22, %v385_v20 }
 0x134   :  { %v399_v29 = vpack.c.bf16 %v388_v25, %v384_v23  ;;  %v401_v30 = vpack.c.bf16 %v390_v26, %v386_v24  ;;  %v313_v31 = vpop.f32.mrb[4].mxu0  ;;  %v364_v32 = vpop.f32.mrb[4].mxu1 }
 0x135   :  { %v379_v33 = vmax.f32 %v313_v31, 0.0  ;;  %v381_v34 = vmax.f32 %v364_v32, 0.0  ;;  %v315_v35 = vpop.f32.mrb[5].mxu0  ;;  %v366_v36 = vpop.f32.mrb[5].mxu1 }
 0x136   :  { %v380_v37 = vmax.f32 %v315_v35, 0.0  ;;  %v382_v38 = vmax.f32 %v366_v36, 0.0  ;;  %v317_v39 = vpop.f32.mrb[6].mxu0  ;;  %v368_v40 = vpop.f32.mrb[6].mxu1  ;;  %694 = vmatprep.mubr.bf16.mxu0 %v399_v29  ;;  %742 = vmatprep.mubr.bf16.mxu1 %v401_v30 }
 0x137   :  { %v318_v41 = vpop.f32.mrb[7].mxu0  ;;  %v369_v42 = vpop.f32.mrb[7].mxu1  ;;  %695 = vmatmul.mubr.bf16.vlgmr.msra.gmra.mrb[8].mxu0 %v398_v27  ;;  %743 = vmatmul.mubr.bf16.vlgmr.msra.gmra.mrb[8].mxu1 %v400_v28  ;;  %v391_v45 = vmul.f32 %v379_v33, %v379_v33  ;;  %v393_v46 = vmul.f32 %v381_v34, %v381_v34 }
 0x138   :  { %v392_v43 = vmul.f32 %v380_v37, %v380_v37  ;;  %v394_v44 = vmul.f32 %v382_v38, %v382_v38 }
 0x139   :  { %v402_v49 = vpack.c.bf16 %v391_v45, %v391_v45  ;;  %v404_v50 = vpack.c.bf16 %v393_v46, %v393_v46 }
 0x13a   :  { %v403_v47 = vpack.c.bf16 %v392_v43, %v392_v43  ;;  %v405_v48 = vpack.c.bf16 %v394_v44, %v394_v44 }
 0x13c   :  { %702 = vmatprep.mubr.bf16.mxu0 %v403_v47  ;;  %750 = vmatprep.mubr.bf16.mxu1 %v405_v48 }
 0x13f   :  { %703 = vmatmul.mubr.bf16.gmra.mrb[12].mxu0 %v402_v49  ;;  %751 = vmatmul.mubr.bf16.gmra.mrb[12].mxu1 %v404_v50 }
 0x20a   :  { %v873_v51 = vpop.f32.mrb[8].mxu0  ;;  %v901_v52 = vpop.f32.mrb[8].mxu1 }
 0x20b   :  { %v874_v53 = vpop.f32.mrb[9].mxu0  ;;  %v902_v54 = vpop.f32.mrb[9].mxu1 }
 0x20c   :  { %v875_v55 = vadd.f32 %v874_v53, %v873_v51  ;;  %v903_v56 = vadd.f32 %v902_v54, %v901_v52  ;;  %v876_v57 = vpop.f32.mrb[10].mxu0  ;;  %v904_v58 = vpop.f32.mrb[10].mxu1 }
 0x20d   :  { %v877_v59 = vpop.f32.mrb[11].mxu0  ;;  %v905_v60 = vpop.f32.mrb[11].mxu1 }
 0x20e   :  { %v745_v61 = vadd.f32 %v903_v56, %v875_v55  ;;  %v878_v62 = vadd.f32 %v877_v59, %v876_v57  ;;  %v906_v63 = vadd.f32 %v905_v60, %v904_v58 }
 0x210   :  { %770 = vst [vmem:[#allocation9] sm:$0xff] %v745_v61  ;;  %v748_v0 = vadd.f32 %v906_v63, %v878_v62 }
 0x212   :  { %771 = vst [vmem:[#allocation9 + $0x8] sm:$0xff] %v748_v0  ;;  %v879_v1 = vpop.f32.mrb[12].mxu0  ;;  %v907_v2 = vpop.f32.mrb[12].mxu1 }
 0x213   :  { %v880_v3 = vpop.f32.mrb[13].mxu0  ;;  %v908_v4 = vpop.f32.mrb[13].mxu1 }
 0x214   :  { %v881_v5 = vadd.f32 %v880_v3, %v879_v1  ;;  %v909_v6 = vadd.f32 %v908_v4, %v907_v2  ;;  %v882_v7 = vpop.f32.mrb[14].mxu0  ;;  %v910_v8 = vpop.f32.mrb[14].mxu1 }
 0x215   :  { %v883_v9 = vpop.f32.mrb[15].mxu0  ;;  %v911_v10 = vpop.f32.mrb[15].mxu1 }
 0x216   :  { %v753_v11 = vadd.f32 %v909_v6, %v881_v5 }
 0x218   :  { %772 = vst [vmem:[#allocation9 + $0x10] sm:$0xff] %v753_v11 }
 0x219   :  { %1083 = shalt.err (!%p1080_p0)
}
 0x21a   :  { %s1084_s27 = scalar_lea.hbm %s1186_s3, 384 }
 0x21b   :  { %p1085_p1 = scmp.ne.s32.totalorder %s1186_s3, %s1084_s27  ;;  %p1088_p2 = scmp.lt.u32.totalorder %s1084_s27, %s1186_s3 }
 0x21d   :  { %p1090_p3 = pnand %p1088_p2, %p1085_p1 }
 0x21f   :  { %1093 = shalt.err (!%p1090_p3)
}
 0x220   :  { %s1109_s5 = smov 128   ;;  %s1110_s6 = smov 8  }
 0x221   :  { %784 = dma.vmem_to_hbm [thread:$0]  %s779_s23, 384, %s1186_s3, [#allocation5], %s1109_s5, %s1109_s5, %s1110_s6  }
 0x222   :  { %1098 = dma.done.wait [#allocation5], 384  }
 0x223   :  { %1099 = vsyncadd [#allocation5], 4294966912 }
 0x224   :  { %788 = vsyncpa [#allocation4], 1 }
 0x225   :  { %789 = vsyncpa [#allocation7], 1 }
 0x226   :  { %790 = vsyncpa [#allocation5], 1 }

</bundles_post_ra>
